<compile_context>
chip_gen: v7x
topology: tpu7x:2x2x1
jax: 0.10.0
libtpu: 0.0.40
codegen_flags: <defaults>
</compile_context>

<pallas_src>
import functools

import jax
import jax.numpy as jnp
from jax.experimental import pallas as pl
from jax.experimental.pallas import tpu as pltpu


def _focal_loss_kernel(logits_ref, targets_ref, out_ref, acc_ref, *,
                       alpha, gamma, n_valid, tile_n):
    # logits_ref: (tile_n, C) float, targets_ref: (tile_n, 1) int32
    # out_ref: (1, 1) f32, acc_ref: (1, 1) f32 VMEM scratch (running sum)
    i = pl.program_id(0)

    @pl.when(i == 0)
    def _init():
        acc_ref[...] = jnp.zeros_like(acc_ref)

    x = logits_ref[...].astype(jnp.float32)             # (tile_n, C)
    t = targets_ref[...]                                 # (tile_n, 1) int32

    # numerically-stable log-softmax
    m = jnp.max(x, axis=-1, keepdims=True)               # (tile_n, 1)
    shifted = x - m                                       # (tile_n, C)
    lse = jnp.log(jnp.sum(jnp.exp(shifted), axis=-1, keepdims=True))

    # gather logit at target class via one-hot mask (VPU-friendly, no gather)
    col = jax.lax.broadcasted_iota(jnp.int32, x.shape, 1)
    onehot = (col == t).astype(jnp.float32)
    logit_t = jnp.sum(shifted * onehot, axis=-1, keepdims=True)

    ce = lse - logit_t                                    # per-sample CE
    pt = jnp.exp(-ce)
    one_minus_pt = jnp.maximum(1.0 - pt, 0.0)             # clamp: no NaN in pow

    g = float(gamma)
    if g.is_integer() and 0.0 <= g <= 4.0:
        # integer power -> unrolled multiplies on the VALU (gamma=2 default)
        w = jnp.ones_like(one_minus_pt)
        for _ in range(int(g)):
            w = w * one_minus_pt
    else:
        w = one_minus_pt ** g

    focal = alpha * w * ce                                # (tile_n, 1)

    # mask rows past the true batch size (ragged last tile / block padding)
    rows = i * tile_n + jax.lax.broadcasted_iota(jnp.int32, focal.shape, 0)
    focal = jnp.where(rows < n_valid, focal, 0.0)

    acc_ref[...] += jnp.sum(focal, axis=0, keepdims=True)  # (1, 1)

    @pl.when(i == pl.num_programs(0) - 1)
    def _finalize():
        out_ref[...] = acc_ref[...] * (1.0 / n_valid)      # mean over true N


def focal_loss(logits, targets, alpha=1.0, gamma=2.0,
               tile_bytes=2 * 1024 * 1024):
    """Pallas implementation of FocalLoss.forward(inputs, targets).

    logits: (N, C) float (f32 or bf16), targets: (N,) integer class indices.
    """
    n, c = logits.shape
    itemsize = jnp.dtype(logits.dtype).itemsize

    # ~2 MiB logits block => 2 buffers x 2 inputs stays well under the
    # v5e 16 MiB / v6e,v7x 32 MiB scoped-VMEM defaults.
    max_rows = max(8, (tile_bytes // (c * itemsize)) // 8 * 8)
    tile_n = n if n <= max_rows else max_rows          # multiple of 8 when < N
    grid = (pl.cdiv(n, tile_n),)

    targets_2d = targets.reshape(n, 1).astype(jnp.int32)

    kernel = functools.partial(
        _focal_loss_kernel,
        alpha=float(alpha), gamma=float(gamma), n_valid=n, tile_n=tile_n,
    )

    cost = pl.CostEstimate(
        flops=6 * n * c,
        transcendentals=n * c + 3 * n,
        bytes_accessed=n * c * itemsize + n * 4 + 4,
    )

    out = pl.pallas_call(
        kernel,
        out_shape=jax.ShapeDtypeStruct((1, 1), jnp.float32),
        grid=grid,
        in_specs=[
            pl.BlockSpec((tile_n, c), lambda i: (i, 0)),
            pl.BlockSpec((tile_n, 1), lambda i: (i, 0)),
        ],
        out_specs=pl.BlockSpec((1, 1), lambda i: (0, 0)),
        scratch_shapes=[pltpu.VMEM((1, 1), jnp.float32)],
        compiler_params=pltpu.CompilerParams(
            # cross-grid accumulator output => reduction axis is "arbitrary"
            dimension_semantics=("arbitrary",),
        ),
        cost_estimate=cost,
    )(logits, targets_2d)
    return out[0, 0]


def _focal_loss_ref(logits, targets, alpha=1.0, gamma=2.0):
    # pure-JAX reference (mirrors torch: CE(none) -> focal -> mean)
    logp = jax.nn.log_softmax(logits.astype(jnp.float32), axis=-1)
    ce = -jnp.take_along_axis(logp, targets[:, None].astype(jnp.int32), axis=-1)[:, 0]
    pt = jnp.exp(-ce)
    return jnp.mean(alpha * (1.0 - pt) ** gamma * ce)


if __name__ == "__main__":
    key = jax.random.PRNGKey(0)
    k1, k2, k3, k4 = jax.random.split(key, 4)

    # Case 1: small shape matching the module (FocalLoss(alpha=1, gamma=2)).
    N, C = 8, 32
    logits = jax.random.normal(k1, (N, C), dtype=jnp.float32)
    targets = jax.random.randint(k2, (N,), 0, C, dtype=jnp.int32)

    loss = jax.block_until_ready(focal_loss(logits, targets, alpha=1.0, gamma=2.0))
    ref = jax.block_until_ready(_focal_loss_ref(logits, targets, alpha=1.0, gamma=2.0))
    assert jnp.allclose(loss, ref, atol=1e-5, rtol=1e-5), (loss, ref)

    # Case 2: exercise the multi-tile grid + ragged-last-tile masking path by
    # forcing a tiny tile (16 rows) on a batch that is not a multiple of it.
    N2, C2 = 100, 32
    logits2 = jax.random.normal(k3, (N2, C2), dtype=jnp.float32)
    targets2 = jax.random.randint(k4, (N2,), 0, C2, dtype=jnp.int32)

    loss2 = jax.block_until_ready(
        focal_loss(logits2, targets2, alpha=1.0, gamma=2.0, tile_bytes=16 * C2 * 4))
    ref2 = jax.block_until_ready(_focal_loss_ref(logits2, targets2, alpha=1.0, gamma=2.0))
    assert jnp.allclose(loss2, ref2, atol=1e-5, rtol=1e-5), (loss2, ref2)

    print("KERNEL_OK")
</pallas_src>

<mosaic_0001>
module attributes {stable_mosaic.version = 11 : i64} {
  func.func @_focal_loss_kernel(%arg0: i32, %arg1: memref<8x32xf32, #tpu.memory_space<vmem>>, %arg2: memref<8x1xi32, #tpu.memory_space<vmem>>, %arg3: memref<1x1xf32, #tpu.memory_space<vmem>>, %arg4: memref<1x1xf32, #tpu.memory_space<vmem>>) attributes {dimension_semantics = [#tpu.dimension_semantics<arbitrary>], iteration_bounds = array<i64: 1>, scalar_prefetch = 0 : i64, scratch_operands = 1 : i64, tpu.core_type = #tpu.core_type<tc>, window_params = [{transform_indices = @transform_0, window_bounds = array<i64: 8, 32>}, {transform_indices = @transform_1, window_bounds = array<i64: 8, 1>}, {pipeline_mode = #tpu.pipeline_mode<synchronous>, transform_indices = @transform_2, window_bounds = array<i64: 1, 1>}]} {
    %c0_i32 = arith.constant 0 : i32
    %0 = arith.cmpi eq, %arg0, %c0_i32 : i32
    %1 = arith.extui %0 : i1 to i32
    %c0_i32_0 = arith.constant 0 : i32
    %2 = arith.cmpi ne, %1, %c0_i32_0 : i32
    scf.if %2 {
      %cst_20 = arith.constant 0.000000e+00 : f32
      %51 = vector.broadcast %cst_20 : f32 to vector<1x1xf32>
      %c0_21 = arith.constant 0 : index
      %c0_22 = arith.constant 0 : index
      %52 = vector.load %arg4[%c0_21, %c0_22] : memref<1x1xf32, #tpu.memory_space<vmem>>, vector<1x1xf32>
      tpu.vector_store %arg4[%c0_21, %c0_22], %51 {strides = array<i32>} : memref<1x1xf32, #tpu.memory_space<vmem>>, vector<1x1xf32>,
    } else {
    }
    %c0 = arith.constant 0 : index
    %c0_1 = arith.constant 0 : index
    %3 = vector.load %arg1[%c0, %c0_1] : memref<8x32xf32, #tpu.memory_space<vmem>>, vector<8x32xf32>
    %c0_2 = arith.constant 0 : index
    %c0_3 = arith.constant 0 : index
    %4 = vector.load %arg2[%c0_2, %c0_3] : memref<8x1xi32, #tpu.memory_space<vmem>>, vector<8x1xi32>
    %cst = arith.constant dense<0xFF800000> : vector<8xf32>
    %5 = vector.multi_reduction <maximumf>, %3, %cst [1] : vector<8x32xf32> to vector<8xf32>
    %6 = vector.shape_cast %5 : vector<8xf32> to vector<8x1xf32>
    %7 = vector.broadcast %6 : vector<8x1xf32> to vector<8x32xf32>
    %8 = arith.subf %3, %7 : vector<8x32xf32>
    %9 = math.exp %8 : vector<8x32xf32>
    %cst_4 = arith.constant dense<0.000000e+00> : vector<8xf32>
    %10 = vector.multi_reduction <add>, %9, %cst_4 [1] : vector<8x32xf32> to vector<8xf32>
    %11 = vector.shape_cast %10 : vector<8xf32> to vector<8x1xf32>
    %12 = math.log %11 : vector<8x1xf32>
    %13 = tpu.iota {dimensions = array<i32: 1>} : vector<8x32xi32>
    %14 = vector.broadcast %4 : vector<8x1xi32> to vector<8x32xi32>
    %15 = arith.cmpi eq, %13, %14 : vector<8x32xi32>
    %16 = arith.extui %15 : vector<8x32xi1> to vector<8x32xi32>
    %17 = arith.sitofp %16 : vector<8x32xi32> to vector<8x32xf32>
    %18 = arith.mulf %8, %17 : vector<8x32xf32>
    %cst_5 = arith.constant dense<0.000000e+00> : vector<8xf32>
    %19 = vector.multi_reduction <add>, %18, %cst_5 [1] : vector<8x32xf32> to vector<8xf32>
    %20 = vector.shape_cast %19 : vector<8xf32> to vector<8x1xf32>
    %21 = arith.subf %12, %20 : vector<8x1xf32>
    %cst_6 = arith.constant 0.000000e+00 : f32
    %22 = vector.broadcast %cst_6 : f32 to vector<8x1xf32>
    %23 = arith.subf %22, %21 : vector<8x1xf32>
    %24 = math.exp %23 : vector<8x1xf32>
    %cst_7 = arith.constant 1.000000e+00 : f32
    %25 = vector.broadcast %cst_7 : f32 to vector<8x1xf32>
    %26 = arith.subf %25, %24 : vector<8x1xf32>
    %cst_8 = arith.constant 0.000000e+00 : f32
    %27 = vector.broadcast %cst_8 : f32 to vector<8x1xf32>
    %28 = arith.maximumf %26, %27 : vector<8x1xf32>
    %cst_9 = arith.constant 1.000000e+00 : f32
    %29 = vector.broadcast %cst_9 : f32 to vector<8x1xf32>
    %30 = arith.mulf %29, %28 : vector<8x1xf32>
    %31 = arith.mulf %30, %28 : vector<8x1xf32>
    %cst_10 = arith.constant 1.000000e+00 : f32
    %32 = vector.broadcast %cst_10 : f32 to vector<8x1xf32>
    %33 = arith.mulf %32, %31 : vector<8x1xf32>
    %34 = arith.mulf %33, %21 : vector<8x1xf32>
    %c8_i32 = arith.constant 8 : i32
    %35 = arith.muli %arg0, %c8_i32 : i32
    %36 = tpu.iota {dimensions = array<i32: 0>} : vector<8x1xi32>
    %37 = vector.broadcast %35 : i32 to vector<8x1xi32>
    %38 = arith.addi %37, %36 : vector<8x1xi32>
    %c8_i32_11 = arith.constant 8 : i32
    %39 = vector.broadcast %c8_i32_11 : i32 to vector<8x1xi32>
    %40 = arith.cmpi slt, %38, %39 : vector<8x1xi32>
    %cst_12 = arith.constant 0.000000e+00 : f32
    %41 = vector.broadcast %cst_12 : f32 to vector<8x1xf32>
    %42 = arith.select %40, %34, %41 : vector<8x1xi1>, vector<8x1xf32>
    %c0_13 = arith.constant 0 : index
    %c0_14 = arith.constant 0 : index
    %43 = vector.load %arg4[%c0_13, %c0_14] : memref<1x1xf32, #tpu.memory_space<vmem>>, vector<1x1xf32>
    %cst_15 = arith.constant dense<0.000000e+00> : vector<1xf32>
    %44 = vector.multi_reduction <add>, %42, %cst_15 [0] : vector<8x1xf32> to vector<1xf32>
    %45 = vector.shape_cast %44 : vector<1xf32> to vector<1x1xf32>
    %46 = arith.addf %43, %45 : vector<1x1xf32>
    %c0_16 = arith.constant 0 : index
    %c0_17 = arith.constant 0 : index
    %47 = vector.load %arg4[%c0_16, %c0_17] : memref<1x1xf32, #tpu.memory_space<vmem>>, vector<1x1xf32>
    tpu.vector_store %arg4[%c0_16, %c0_17], %46 {strides = array<i32>} : memref<1x1xf32, #tpu.memory_space<vmem>>, vector<1x1xf32>,
    %c0_i32_18 = arith.constant 0 : i32
    %48 = arith.cmpi eq, %arg0, %c0_i32_18 : i32
    %49 = arith.extui %48 : i1 to i32
    %c0_i32_19 = arith.constant 0 : i32
    %50 = arith.cmpi ne, %49, %c0_i32_19 : i32
    scf.if %50 {
      %c0_20 = arith.constant 0 : index
      %c0_21 = arith.constant 0 : index
      %51 = vector.load %arg4[%c0_20, %c0_21] : memref<1x1xf32, #tpu.memory_space<vmem>>, vector<1x1xf32>
      %cst_22 = arith.constant 1.250000e-01 : f32
      %52 = vector.broadcast %cst_22 : f32 to vector<1x1xf32>
      %53 = arith.mulf %51, %52 : vector<1x1xf32>
      %c0_23 = arith.constant 0 : index
      %c0_24 = arith.constant 0 : index
      %54 = vector.load %arg3[%c0_23, %c0_24] : memref<1x1xf32, #tpu.memory_space<vmem>>, vector<1x1xf32>
      tpu.vector_store %arg3[%c0_23, %c0_24], %53 {strides = array<i32>} : memref<1x1xf32, #tpu.memory_space<vmem>>, vector<1x1xf32>,
    } else {
    }
    return
  }
  func.func @transform_0(%arg0: i32) -> (i32, i32) {
    %c0_i32 = arith.constant 0 : i32
    %c0_i32_0 = arith.constant 0 : i32
    return %arg0, %c0_i32 : i32, i32
  }
  func.func @transform_1(%arg0: i32) -> (i32, i32) {
    %c0_i32 = arith.constant 0 : i32
    %c0_i32_0 = arith.constant 0 : i32
    return %arg0, %c0_i32 : i32, i32
  }
  func.func @transform_2(%arg0: i32) -> (i32, i32) {
    %c0_i32 = arith.constant 0 : i32
    %c0_i32_0 = arith.constant 0 : i32
    %c0_i32_1 = arith.constant 0 : i32
    return %c0_i32, %c0_i32_0 : i32, i32
  }
}

</mosaic_0001>

<bundles_post_ra>
// kernel: tpu_custom_call.1
= control target key start
LH: loop header
LB: loop body
LE: loop exit
PB: predicated region body
PF: predicated region fallthrough
CT: control target
= control target key end

     0   :  { %vm20_vm0 = vcmask 261120   ;;  %s166_s0 = inlined_call_operand.vmem [shape: f32[8,32], index: 0, kind: input, shape index: {}]   ;;  %s167_s1 = inlined_call_operand.vmem [shape: s32[8,1], index: 1, kind: input, shape index: {}]   ;;  %s168_s2 = inlined_call_operand.hbm [shape: f32[1,1], index: 2, kind: output, shape index: {}]  }
   0x1   :  { %v18_v0 = vld [vmem:[%s166_s0] sm:$0xff] }
   0x2   :  { %7 = vsyncpa [#allocation4], 0  ;;  %v21_v1 = vsel %vm20_vm0, %v18_v0, -inf  ;;  %v124_v2 = vmov 0   ;;  %v19_v3 = vld [vmem:[%s167_s1] sm:$0xff]  ;;  %vm16_vm1 = vcmask 0   ;;  %v32_v7 = vlaneseq }
   0x3   :  { %93 = vset.pattern.permute.xlu0 %v124_v2  ;;  %v125_v4 = vmov 0.0   ;;  %s126_s0 = smov [#allocation3]  }
   0x4   :  { %22 = vmax.xlane.f32.xlu0 %v21_v1  ;;  %17 = vst.msk [vmem:[#allocation2] sm:$0x1] %vm16_vm1, %v125_v4  ;;  %v33_v9 = vand.u32 127, %v32_v7  ;;  %s81_s1 = sshll.u32 %s126_s0, 4  ;;  %s82_s1 = int_to_ptr.vmem [resolvable:$true] %s81_s1 }
   0x5   :  { %s100_s13 = scalar_lea.vmem %s82_s1, 16  ;;  %s104_s14 = scalar_lea.vmem %s82_s1, 32 }
   0x6   :  { %p101_p0 = scmp.ne.s32.totalorder %s82_s1, %s100_s13  ;;  %p105_p1 = scmp.lt.s32.totalorder %s82_s1, %s82_s1 }
   0x7   :  { %p106_p2 = scmp.lt.s32.totalorder %s104_s14, %s100_s13 }
   0x9   :  { %p107_p3 = por %p106_p2, %p105_p1 }
   0xb   :  { %v59_v33 = vld [vmem:[#allocation2] sm:$0x1]  ;;  %p108_p4 = pnand %p107_p3, %p101_p0 }
  0x1a   :  { %35 = vperm.xlu0 %93, %v19_v3  }
  0x91   :  { %v23_v5 = vpop.xlane.xlu0 %22 }
  0x92   :  { %v24_v6 = vsub.f32 %v18_v0, %v23_v5 }
  0x94   :  { %v25_v8 = vmul.f32 1.442695, %v24_v6 }
  0x96   :  { %94 = vpow2.f32 %v25_v8 }
  0x99   :  { %v36_v10 = vpop.permute.xlu0 %35 }
  0x9a   :  { %vm37_vm2 = vcmp.eq.s32.totalorder %v33_v9, %v36_v10 }
  0x9b   :  { %v89_v11 = vsel %vm37_vm2, 1.0, %v125_v4 }
  0x9c   :  { %v40_v14 = vmul.f32 %v89_v11, %v24_v6 }
  0x9e   :  { %v41_v15 = vsel %vm20_vm0, %v40_v14, 0.0 }
  0xa0   :  { %v95_v12 = vpop.eup %94 }
  0xa1   :  { %v27_v13 = vsel %vm20_vm0, %v95_v12, 0.0 }
  0xa2   :  { %28 = vadd.xlane.f32.xlu1 %v27_v13 }
  0xa6   :  { %42 = vadd.xlane.f32.xlu1 %v41_v15 }
 0x12f   :  { %v29_v16 = vpop.xlane.xlu1 %28 }
 0x130   :  { %96 = vlog2.f32 %v29_v16 }
 0x133   :  { %v43_v19 = vpop.xlane.xlu1 %42 }
 0x13a   :  { %v97_v17 = vpop.eup %96 }
 0x13b   :  { %v31_v18 = vmul.f32 0.6931472, %v97_v17 }
 0x13d   :  { %v44_v20 = vsub.f32 %v31_v18, %v43_v19 }
 0x13f   :  { %v45_v21 = vsub.f32 0.0, %v44_v20 }
 0x141   :  { %v46_v22 = vmul.f32 1.442695, %v45_v21 }
 0x143   :  { %98 = vpow2.f32 %v46_v22 }
 0x14d   :  { %v99_v23 = vpop.eup %98 }
 0x14e   :  { %v48_v24 = vsub.f32 1.0, %v99_v23 }
 0x150   :  { %v49_v25 = vmax.f32 %v48_v24, 0.0 }
 0x152   :  { %v50_v26 = vmul.f32 %v49_v25, %v49_v25 }
 0x154   :  { %v51_v27 = vmul.f32 %v50_v26, %v44_v20 }
 0x156   :  { %v60_v28 = vrot.slane %v51_v27, 4 }
 0x158   :  { %v61_v29 = vadd.f32 %v60_v28, %v51_v27 }
 0x15a   :  { %v62_v30 = vrot.slane %v61_v29, 2 }
 0x15c   :  { %v63_v31 = vadd.f32 %v62_v30, %v61_v29 }
 0x15e   :  { %v64_v32 = vrot.slane %v63_v31, 1 }
 0x160   :  { %v65_v34 = vadd.f32 %v64_v32, %v63_v31 }
 0x162   :  { %v66_v35 = vadd.f32 %v65_v34, %v59_v33 }
 0x164   :  { %68 = vst.msk [vmem:[#allocation2] sm:$0x1] %vm16_vm1, %v66_v35 }
 0x16b   :  { %v72_v36 = vld [vmem:[#allocation2] sm:$0x1] }
 0x16c   :  { %v73_v37 = vmul.f32 0.125, %v72_v36 }
 0x16e   :  { %74 = vst.msk [vmem:[#allocation3] sm:$0x1] %vm16_vm1, %v73_v37 }
 0x16f   :  { %111 = shalt.err (!%p108_p4)
}
 0x170   :  { %s112_s17 = scalar_lea.hbm %s168_s2, 16 }
 0x171   :  { %p113_p5 = scmp.ne.s32.totalorder %s168_s2, %s112_s17  ;;  %p116_p6 = scmp.lt.u32.totalorder %s112_s17, %s168_s2 }
 0x173   :  { %p118_p7 = pnand %p116_p6, %p113_p5 }
 0x175   :  { %121 = shalt.err (!%p118_p7)
}
 0x176   :  { %84 = dma.vmem_to_hbm [thread:$0]  %s82_s1, 16, %s168_s2, [#allocation4]  }
 0x177   :  { %122 = dma.done.wait [#allocation4], 16  }
 0x178   :  { %123 = vsyncadd [#allocation4], 4294967280 }
 0x179   :  { %88 = vsyncpa [#allocation4], 1 }

</bundles_post_ra>
